<compile_context>
chip_gen: v7x
topology: tpu7x:2x2x1
jax: 0.10.0
libtpu: 0.0.40
codegen_flags: <defaults>
</compile_context>

<pallas_src>
import jax
import jax.numpy as jnp
import numpy as np
from jax.experimental import pallas as pl
from jax.experimental.pallas import tpu as pltpu


def bilstm_recurrence_kernel(xg_ref, w_hh_ref, seq_ref, h_ref, c_ref):
    """One T-chunk of the fused bidirectional LSTM recurrence.

    xg_ref  : (CT, 2B, 4H) input projections (+bias); rows 0:B forward stream,
              rows B:2B backward stream already time-reversed.
    w_hh_ref: (H, 8H) recurrent weights, lanes 0:4H forward / 4H:8H backward,
              gate columns within each half stacked [i | f | g | o].
    seq_ref : (CT, 2B, H) hidden outputs (same row layout as xg_ref).
    h_ref/c_ref : (2B, H) VMEM scratch carries, persistent across chunks.
    """
    CT, B2, H4 = xg_ref.shape
    H = H4 // 4
    B = B2 // 2

    @pl.when(pl.program_id(0) == 0)
    def _():
        h_ref[...] = jnp.zeros_like(h_ref)
        c_ref[...] = jnp.zeros_like(c_ref)

    # Resident for the whole chunk.
    w_hh = w_hh_ref[...]                                             # (H, 8H)

    # Hoisted masks (built once, reused every step).
    row_ids = jax.lax.broadcasted_iota(jnp.int32, (B2, H4), 0)
    is_fwd_row = row_ids < B                                         # top half rows = forward
    lane_ids = jax.lax.broadcasted_iota(jnp.int32, (B2, H4), 1)
    is_g_lane = (lane_ids >= 2 * H) & (lane_ids < 3 * H)             # g-gate lane range

    def step(t, carry):
        h, c = carry                                                 # (2B, H)
        # One fused MXU push for both directions: (2B, H) @ (H, 8H).
        mm = jnp.dot(h, w_hh, preferred_element_type=jnp.float32)    # (2B, 8H)
        # Forward rows keep lanes 0:4H, backward rows keep lanes 4H:8H
        # (both slices are vreg-aligned; cross blocks are discarded).
        rec = jnp.where(is_fwd_row, mm[:, 0:H4], mm[:, H4:2 * H4])   # (2B, 4H)
        gates = xg_ref[t] + rec
        # 2 transcendental launches over the full gate vreg instead of 4 slices.
        sg = jax.nn.sigmoid(gates)
        th = jnp.tanh(gates)
        acts = jnp.where(is_g_lane, th, sg)
        i = acts[:, 0:H]
        f = acts[:, H:2 * H]
        g = acts[:, 2 * H:3 * H]
        o = acts[:, 3 * H:4 * H]
        c_new = f * c + i * g
        h_new = o * jnp.tanh(c_new)
        # Single dense (2B, H) store per step (no lane shift for the backward half).
        seq_ref[t] = h_new
        return (h_new, c_new)

    h_fin, c_fin = jax.lax.fori_loop(
        0, CT, step, (h_ref[...], c_ref[...]), unroll=True)
    h_ref[...] = h_fin
    c_ref[...] = c_fin


def bilstm_forward(x_emb_tbe, params, *, t_chunk=4):
    """Embedded sequence (T, B, E) -> (hidden seq (T, B, 2H), prediction (B, OUT))."""
    T, B, E = x_emb_tbe.shape
    H = params["w_hh_f"].shape[0]
    assert T % t_chunk == 0, "T must be divisible by t_chunk"
    B2 = 2 * B

    # Hoisted input-to-hidden projection, both directions fused into one
    # (T*B, E) @ (E, 8H) matmul with combined biases folded in.
    x2d = x_emb_tbe.reshape(T * B, E)
    w_ih_cat = jnp.concatenate([params["w_ih_f"], params["w_ih_b"]], axis=1)  # (E, 8H)
    b_cat = jnp.concatenate([params["b_f"], params["b_b"]], axis=1)           # (1, 8H)
    xg = (x2d @ w_ih_cat + b_cat).reshape(T, B, 8 * H)
    xg_f = xg[..., : 4 * H]
    xg_b_rev = xg[..., 4 * H:][::-1]          # pre-reverse backward stream: both index with t
    xg_cat = jnp.concatenate([xg_f, xg_b_rev], axis=1)                        # (T, 2B, 4H)

    # Recurrent weights with directions fused on the lane axis.
    w_hh_cat = jnp.concatenate([params["w_hh_f"], params["w_hh_b"]], axis=1)  # (H, 8H)

    n_chunks = T // t_chunk
    seq_out = pl.pallas_call(
        bilstm_recurrence_kernel,
        grid_spec=pltpu.PrefetchScalarGridSpec(
            num_scalar_prefetch=0,
            grid=(n_chunks,),  # T-chunks: BlockSpec double-buffers xg / writes back seq per chunk
            in_specs=[
                pl.BlockSpec((t_chunk, B2, 4 * H), lambda i: (i, 0, 0)),  # xg chunk
                pl.BlockSpec((H, 8 * H), lambda i: (0, 0)),               # fused W_hh (resident)
            ],
            out_specs=pl.BlockSpec((t_chunk, B2, H), lambda i: (i, 0, 0)),
            scratch_shapes=[
                pltpu.VMEM((B2, H), jnp.float32),   # h carry (both directions)
                pltpu.VMEM((B2, H), jnp.float32),   # c carry (both directions)
            ],
        ),
        out_shape=jax.ShapeDtypeStruct((T, B2, H), jnp.float32),
        compiler_params=pltpu.CompilerParams(dimension_semantics=("arbitrary",)),
    )(xg_cat, w_hh_cat)

    # Reassemble the (T, B, 2H) hidden sequence in the wrapper (layout plumbing).
    seq_f = seq_out[:, 0:B, :]
    seq_b = seq_out[:, B:2 * B, :][::-1]      # undo the time reversal of the backward stream
    seq = jnp.concatenate([seq_f, seq_b], axis=-1)

    # Prediction head on the final states of both directions; both live in the
    # last row-block of seq_out (forward final at t=T-1, backward final after
    # processing the whole reversed stream).
    h_f_final = seq_out[T - 1, 0:B, :]
    h_b_final = seq_out[T - 1, B:2 * B, :]
    pred = (h_f_final @ params["w_out_f"]
            + h_b_final @ params["w_out_b"]
            + params["b_out"])
    return seq, pred


def reference_bilstm(x_emb_tbe, params):
    """Pure-JAX reference with identical semantics (for correctness check)."""
    T, B, E = x_emb_tbe.shape
    H = params["w_hh_f"].shape[0]

    def run(xg, w_hh):
        def step(carry, g):
            h, c = carry
            gates = g + h @ w_hh
            i = jax.nn.sigmoid(gates[:, 0:H])
            f = jax.nn.sigmoid(gates[:, H:2 * H])
            gg = jnp.tanh(gates[:, 2 * H:3 * H])
            o = jax.nn.sigmoid(gates[:, 3 * H:4 * H])
            c = f * c + i * gg
            h = o * jnp.tanh(c)
            return (h, c), h

        init = (jnp.zeros((B, H), jnp.float32), jnp.zeros((B, H), jnp.float32))
        _, hs = jax.lax.scan(step, init, xg)
        return hs  # (T, B, H)

    x2d = x_emb_tbe.reshape(T * B, E)
    xg_f = (x2d @ params["w_ih_f"] + params["b_f"]).reshape(T, B, 4 * H)
    xg_b = (x2d @ params["w_ih_b"] + params["b_b"]).reshape(T, B, 4 * H)
    hs_f = run(xg_f, params["w_hh_f"])
    hs_b = run(xg_b[::-1], params["w_hh_b"])[::-1]
    seq = jnp.concatenate([hs_f, hs_b], axis=-1)
    pred = (hs_f[-1] @ params["w_out_f"]
            + hs_b[0] @ params["w_out_b"]
            + params["b_out"])
    return seq, pred


if __name__ == "__main__":
    key = jax.random.PRNGKey(0)
    V, E, H, B, T, OUT = 49, 128, 32, 4, 8, 1   # vocab from pretain_voc, emb dim 128
    ks = jax.random.split(key, 10)
    scale = 0.1

    emb_table = jax.random.uniform(ks[0], (V, E), jnp.float32, -0.1, 0.1)
    params = dict(
        w_ih_f=scale * jax.random.normal(ks[1], (E, 4 * H), jnp.float32),
        w_hh_f=scale * jax.random.normal(ks[2], (H, 4 * H), jnp.float32),
        b_f=0.05 * jax.random.normal(ks[8], (1, 4 * H), jnp.float32),
        w_ih_b=scale * jax.random.normal(ks[3], (E, 4 * H), jnp.float32),
        w_hh_b=scale * jax.random.normal(ks[4], (H, 4 * H), jnp.float32),
        b_b=0.05 * jax.random.normal(ks[9], (1, 4 * H), jnp.float32),
        w_out_f=scale * jax.random.normal(ks[5], (H, OUT), jnp.float32),
        w_out_b=scale * jax.random.normal(ks[6], (H, OUT), jnp.float32),
        b_out=jnp.zeros((1, OUT), jnp.float32),
    )

    tokens = jax.random.randint(ks[7], (B, T), 0, V, jnp.int32)   # "data": SMILES token ids
    x_emb = jnp.take(emb_table, tokens, axis=0)                   # (B, T, E) embedding glue
    x_emb_tbe = jnp.transpose(x_emb, (1, 0, 2))                   # (T, B, E) time-major

    seq, pred = bilstm_forward(x_emb_tbe, params, t_chunk=4)
    jax.block_until_ready((seq, pred))

    seq_ref, pred_ref = reference_bilstm(x_emb_tbe, params)
    assert np.allclose(np.asarray(seq), np.asarray(seq_ref), atol=5e-3, rtol=5e-3), \
        "hidden-sequence mismatch vs pure-JAX reference"
    assert np.allclose(np.asarray(pred), np.asarray(pred_ref), atol=5e-3, rtol=5e-3), \
        "prediction mismatch vs pure-JAX reference"

    print("KERNEL_OK")
</pallas_src>

<mosaic_0001>
module attributes {stable_mosaic.version = 11 : i64} {
  func.func @bilstm_recurrence_kernel(%arg0: i32, %arg1: memref<4x8x128xf32, #tpu.memory_space<vmem>>, %arg2: memref<32x256xf32, #tpu.memory_space<vmem>>, %arg3: memref<4x8x32xf32, #tpu.memory_space<vmem>>, %arg4: memref<8x32xf32, #tpu.memory_space<vmem>>, %arg5: memref<8x32xf32, #tpu.memory_space<vmem>>) attributes {dimension_semantics = [#tpu.dimension_semantics<arbitrary>], iteration_bounds = array<i64: 2>, scalar_prefetch = 0 : i64, scratch_operands = 2 : i64, tpu.core_type = #tpu.core_type<tc>, window_params = [{transform_indices = @transform_0, window_bounds = array<i64: 4, 8, 128>}, {pipeline_mode = #tpu.pipeline_mode<synchronous>, transform_indices = @transform_1, window_bounds = array<i64: 32, 256>}, {transform_indices = @transform_2, window_bounds = array<i64: 4, 8, 32>}]} {
    %c0_i32 = arith.constant 0 : i32
    %0 = arith.cmpi eq, %arg0, %c0_i32 : i32
    %1 = arith.extui %0 : i1 to i32
    %c0_i32_0 = arith.constant 0 : i32
    %2 = arith.cmpi ne, %1, %c0_i32_0 : i32
    scf.if %2 {
      %cst_35 = arith.constant 0.000000e+00 : f32
      %129 = vector.broadcast %cst_35 : f32 to vector<8x32xf32>
      %c0_36 = arith.constant 0 : index
      %c0_37 = arith.constant 0 : index
      %130 = vector.load %arg4[%c0_36, %c0_37] : memref<8x32xf32, #tpu.memory_space<vmem>>, vector<8x32xf32>
      tpu.vector_store %arg4[%c0_36, %c0_37], %129 {strides = array<i32>} : memref<8x32xf32, #tpu.memory_space<vmem>>, vector<8x32xf32>,
      %cst_38 = arith.constant 0.000000e+00 : f32
      %131 = vector.broadcast %cst_38 : f32 to vector<8x32xf32>
      %c0_39 = arith.constant 0 : index
      %c0_40 = arith.constant 0 : index
      %132 = vector.load %arg5[%c0_39, %c0_40] : memref<8x32xf32, #tpu.memory_space<vmem>>, vector<8x32xf32>
      tpu.vector_store %arg5[%c0_39, %c0_40], %131 {strides = array<i32>} : memref<8x32xf32, #tpu.memory_space<vmem>>, vector<8x32xf32>,
    } else {
    }
    %c0 = arith.constant 0 : index
    %c0_1 = arith.constant 0 : index
    %3 = vector.load %arg2[%c0, %c0_1] : memref<32x256xf32, #tpu.memory_space<vmem>>, vector<32x256xf32>
    %4 = tpu.iota {dimensions = array<i32: 0>} : vector<8x128xi32>
    %c4_i32 = arith.constant 4 : i32
    %5 = vector.broadcast %c4_i32 : i32 to vector<8x128xi32>
    %6 = arith.cmpi slt, %4, %5 : vector<8x128xi32>
    %7 = tpu.iota {dimensions = array<i32: 1>} : vector<8x128xi32>
    %c64_i32 = arith.constant 64 : i32
    %8 = vector.broadcast %c64_i32 : i32 to vector<8x128xi32>
    %9 = arith.cmpi sge, %7, %8 : vector<8x128xi32>
    %c96_i32 = arith.constant 96 : i32
    %10 = vector.broadcast %c96_i32 : i32 to vector<8x128xi32>
    %11 = arith.cmpi slt, %7, %10 : vector<8x128xi32>
    %12 = arith.andi %9, %11 : vector<8x128xi1>
    %c0_2 = arith.constant 0 : index
    %c0_3 = arith.constant 0 : index
    %13 = vector.load %arg4[%c0_2, %c0_3] : memref<8x32xf32, #tpu.memory_space<vmem>>, vector<8x32xf32>
    %c0_4 = arith.constant 0 : index
    %c0_5 = arith.constant 0 : index
    %14 = vector.load %arg5[%c0_4, %c0_5] : memref<8x32xf32, #tpu.memory_space<vmem>>, vector<8x32xf32>
    %c0_i32_6 = arith.constant 0 : i32
    %cst = arith.constant dense<0.000000e+00> : vector<8x256xf32>
    %15 = tpu.matmul %13, %3, %cst {dimension_numbers = #tpu.dot_dimension_numbers<[1], [0], [0], [1], [0, 0, 1, 1], [], []>} : vector<8x32xf32>, vector<32x256xf32>, vector<8x256xf32> -> vector<8x256xf32>
    %16 = vector.extract_strided_slice %15 {offsets = [0, 0], sizes = [8, 128], strides = [1, 1]} : vector<8x256xf32> to vector<8x128xf32>
    %17 = vector.extract_strided_slice %15 {offsets = [0, 128], sizes = [8, 128], strides = [1, 1]} : vector<8x256xf32> to vector<8x128xf32>
    %18 = arith.select %6, %16, %17 : vector<8x128xi1>, vector<8x128xf32>
    %19 = arith.index_cast %c0_i32_6 : i32 to index
    %c0_7 = arith.constant 0 : index
    %c0_8 = arith.constant 0 : index
    %20 = vector.load %arg1[%19, %c0_7, %c0_8] : memref<4x8x128xf32, #tpu.memory_space<vmem>>, vector<1x8x128xf32>
    %21 = vector.shape_cast %20 : vector<1x8x128xf32> to vector<8x128xf32>
    %22 = arith.addf %21, %18 : vector<8x128xf32>
    %23 = arith.negf %22 : vector<8x128xf32>
    %24 = math.exp %23 : vector<8x128xf32>
    %cst_9 = arith.constant 1.000000e+00 : f32
    %25 = vector.broadcast %cst_9 : f32 to vector<8x128xf32>
    %26 = arith.addf %25, %24 : vector<8x128xf32>
    %27 = arith.divf %25, %26 : vector<8x128xf32>
    %28 = math.tanh %22 : vector<8x128xf32>
    %29 = arith.select %12, %28, %27 : vector<8x128xi1>, vector<8x128xf32>
    %30 = vector.extract_strided_slice %29 {offsets = [0, 0], sizes = [8, 32], strides = [1, 1]} : vector<8x128xf32> to vector<8x32xf32>
    %31 = vector.extract_strided_slice %29 {offsets = [0, 32], sizes = [8, 32], strides = [1, 1]} : vector<8x128xf32> to vector<8x32xf32>
    %32 = vector.extract_strided_slice %29 {offsets = [0, 64], sizes = [8, 32], strides = [1, 1]} : vector<8x128xf32> to vector<8x32xf32>
    %33 = vector.extract_strided_slice %29 {offsets = [0, 96], sizes = [8, 32], strides = [1, 1]} : vector<8x128xf32> to vector<8x32xf32>
    %34 = arith.mulf %31, %14 : vector<8x32xf32>
    %35 = arith.mulf %30, %32 : vector<8x32xf32>
    %36 = arith.addf %34, %35 : vector<8x32xf32>
    %37 = math.tanh %36 : vector<8x32xf32>
    %38 = arith.mulf %33, %37 : vector<8x32xf32>
    %39 = arith.index_cast %c0_i32_6 : i32 to index
    %c0_10 = arith.constant 0 : index
    %c0_11 = arith.constant 0 : index
    %40 = vector.load %arg3[%39, %c0_10, %c0_11] : memref<4x8x32xf32, #tpu.memory_space<vmem>>, vector<1x8x32xf32>
    %41 = vector.shape_cast %40 : vector<1x8x32xf32> to vector<8x32xf32>
    %42 = vector.shape_cast %38 : vector<8x32xf32> to vector<1x8x32xf32>
    tpu.vector_store %arg3[%39, %c0_10, %c0_11], %42 {strides = array<i32>} : memref<4x8x32xf32, #tpu.memory_space<vmem>>, vector<1x8x32xf32>,
    %c1_i32 = arith.constant 1 : i32
    %cst_12 = arith.constant dense<0.000000e+00> : vector<8x256xf32>
    %43 = tpu.matmul %38, %3, %cst_12 {dimension_numbers = #tpu.dot_dimension_numbers<[1], [0], [0], [1], [0, 0, 1, 1], [], []>} : vector<8x32xf32>, vector<32x256xf32>, vector<8x256xf32> -> vector<8x256xf32>
    %44 = vector.extract_strided_slice %43 {offsets = [0, 0], sizes = [8, 128], strides = [1, 1]} : vector<8x256xf32> to vector<8x128xf32>
    %45 = vector.extract_strided_slice %43 {offsets = [0, 128], sizes = [8, 128], strides = [1, 1]} : vector<8x256xf32> to vector<8x128xf32>
    %46 = arith.select %6, %44, %45 : vector<8x128xi1>, vector<8x128xf32>
    %47 = arith.index_cast %c1_i32 : i32 to index
    %c0_13 = arith.constant 0 : index
    %c0_14 = arith.constant 0 : index
    %48 = vector.load %arg1[%47, %c0_13, %c0_14] : memref<4x8x128xf32, #tpu.memory_space<vmem>>, vector<1x8x128xf32>
    %49 = vector.shape_cast %48 : vector<1x8x128xf32> to vector<8x128xf32>
    %50 = arith.addf %49, %46 : vector<8x128xf32>
    %51 = arith.negf %50 : vector<8x128xf32>
    %52 = math.exp %51 : vector<8x128xf32>
    %cst_15 = arith.constant 1.000000e+00 : f32
    %53 = vector.broadcast %cst_15 : f32 to vector<8x128xf32>
    %54 = arith.addf %53, %52 : vector<8x128xf32>
    %55 = arith.divf %53, %54 : vector<8x128xf32>
    %56 = math.tanh %50 : vector<8x128xf32>
    %57 = arith.select %12, %56, %55 : vector<8x128xi1>, vector<8x128xf32>
    %58 = vector.extract_strided_slice %57 {offsets = [0, 0], sizes = [8, 32], strides = [1, 1]} : vector<8x128xf32> to vector<8x32xf32>
    %59 = vector.extract_strided_slice %57 {offsets = [0, 32], sizes = [8, 32], strides = [1, 1]} : vector<8x128xf32> to vector<8x32xf32>
    %60 = vector.extract_strided_slice %57 {offsets = [0, 64], sizes = [8, 32], strides = [1, 1]} : vector<8x128xf32> to vector<8x32xf32>
    %61 = vector.extract_strided_slice %57 {offsets = [0, 96], sizes = [8, 32], strides = [1, 1]} : vector<8x128xf32> to vector<8x32xf32>
    %62 = arith.mulf %59, %36 : vector<8x32xf32>
    %63 = arith.mulf %58, %60 : vector<8x32xf32>
    %64 = arith.addf %62, %63 : vector<8x32xf32>
    %65 = math.tanh %64 : vector<8x32xf32>
    %66 = arith.mulf %61, %65 : vector<8x32xf32>
    %67 = arith.index_cast %c1_i32 : i32 to index
    %c0_16 = arith.constant 0 : index
    %c0_17 = arith.constant 0 : index
    %68 = vector.load %arg3[%67, %c0_16, %c0_17] : memref<4x8x32xf32, #tpu.memory_space<vmem>>, vector<1x8x32xf32>
    %69 = vector.shape_cast %68 : vector<1x8x32xf32> to vector<8x32xf32>
    %70 = vector.shape_cast %66 : vector<8x32xf32> to vector<1x8x32xf32>
    tpu.vector_store %arg3[%67, %c0_16, %c0_17], %70 {strides = array<i32>} : memref<4x8x32xf32, #tpu.memory_space<vmem>>, vector<1x8x32xf32>,
    %c2_i32 = arith.constant 2 : i32
    %cst_18 = arith.constant dense<0.000000e+00> : vector<8x256xf32>
    %71 = tpu.matmul %66, %3, %cst_18 {dimension_numbers = #tpu.dot_dimension_numbers<[1], [0], [0], [1], [0, 0, 1, 1], [], []>} : vector<8x32xf32>, vector<32x256xf32>, vector<8x256xf32> -> vector<8x256xf32>
    %72 = vector.extract_strided_slice %71 {offsets = [0, 0], sizes = [8, 128], strides = [1, 1]} : vector<8x256xf32> to vector<8x128xf32>
    %73 = vector.extract_strided_slice %71 {offsets = [0, 128], sizes = [8, 128], strides = [1, 1]} : vector<8x256xf32> to vector<8x128xf32>
    %74 = arith.select %6, %72, %73 : vector<8x128xi1>, vector<8x128xf32>
    %75 = arith.index_cast %c2_i32 : i32 to index
    %c0_19 = arith.constant 0 : index
    %c0_20 = arith.constant 0 : index
    %76 = vector.load %arg1[%75, %c0_19, %c0_20] : memref<4x8x128xf32, #tpu.memory_space<vmem>>, vector<1x8x128xf32>
    %77 = vector.shape_cast %76 : vector<1x8x128xf32> to vector<8x128xf32>
    %78 = arith.addf %77, %74 : vector<8x128xf32>
    %79 = arith.negf %78 : vector<8x128xf32>
    %80 = math.exp %79 : vector<8x128xf32>
    %cst_21 = arith.constant 1.000000e+00 : f32
    %81 = vector.broadcast %cst_21 : f32 to vector<8x128xf32>
    %82 = arith.addf %81, %80 : vector<8x128xf32>
    %83 = arith.divf %81, %82 : vector<8x128xf32>
    %84 = math.tanh %78 : vector<8x128xf32>
    %85 = arith.select %12, %84, %83 : vector<8x128xi1>, vector<8x128xf32>
    %86 = vector.extract_strided_slice %85 {offsets = [0, 0], sizes = [8, 32], strides = [1, 1]} : vector<8x128xf32> to vector<8x32xf32>
    %87 = vector.extract_strided_slice %85 {offsets = [0, 32], sizes = [8, 32], strides = [1, 1]} : vector<8x128xf32> to vector<8x32xf32>
    %88 = vector.extract_strided_slice %85 {offsets = [0, 64], sizes = [8, 32], strides = [1, 1]} : vector<8x128xf32> to vector<8x32xf32>
    %89 = vector.extract_strided_slice %85 {offsets = [0, 96], sizes = [8, 32], strides = [1, 1]} : vector<8x128xf32> to vector<8x32xf32>
    %90 = arith.mulf %87, %64 : vector<8x32xf32>
    %91 = arith.mulf %86, %88 : vector<8x32xf32>
    %92 = arith.addf %90, %91 : vector<8x32xf32>
    %93 = math.tanh %92 : vector<8x32xf32>
    %94 = arith.mulf %89, %93 : vector<8x32xf32>
    %95 = arith.index_cast %c2_i32 : i32 to index
    %c0_22 = arith.constant 0 : index
    %c0_23 = arith.constant 0 : index
    %96 = vector.load %arg3[%95, %c0_22, %c0_23] : memref<4x8x32xf32, #tpu.memory_space<vmem>>, vector<1x8x32xf32>
    %97 = vector.shape_cast %96 : vector<1x8x32xf32> to vector<8x32xf32>
    %98 = vector.shape_cast %94 : vector<8x32xf32> to vector<1x8x32xf32>
    tpu.vector_store %arg3[%95, %c0_22, %c0_23], %98 {strides = array<i32>} : memref<4x8x32xf32, #tpu.memory_space<vmem>>, vector<1x8x32xf32>,
    %c3_i32 = arith.constant 3 : i32
    %cst_24 = arith.constant dense<0.000000e+00> : vector<8x256xf32>
    %99 = tpu.matmul %94, %3, %cst_24 {dimension_numbers = #tpu.dot_dimension_numbers<[1], [0], [0], [1], [0, 0, 1, 1], [], []>} : vector<8x32xf32>, vector<32x256xf32>, vector<8x256xf32> -> vector<8x256xf32>
    %100 = vector.extract_strided_slice %99 {offsets = [0, 0], sizes = [8, 128], strides = [1, 1]} : vector<8x256xf32> to vector<8x128xf32>
    %101 = vector.extract_strided_slice %99 {offsets = [0, 128], sizes = [8, 128], strides = [1, 1]} : vector<8x256xf32> to vector<8x128xf32>
    %102 = arith.select %6, %100, %101 : vector<8x128xi1>, vector<8x128xf32>
    %103 = arith.index_cast %c3_i32 : i32 to index
    %c0_25 = arith.constant 0 : index
    %c0_26 = arith.constant 0 : index
    %104 = vector.load %arg1[%103, %c0_25, %c0_26] : memref<4x8x128xf32, #tpu.memory_space<vmem>>, vector<1x8x128xf32>
    %105 = vector.shape_cast %104 : vector<1x8x128xf32> to vector<8x128xf32>
    %106 = arith.addf %105, %102 : vector<8x128xf32>
    %107 = arith.negf %106 : vector<8x128xf32>
    %108 = math.exp %107 : vector<8x128xf32>
    %cst_27 = arith.constant 1.000000e+00 : f32
    %109 = vector.broadcast %cst_27 : f32 to vector<8x128xf32>
    %110 = arith.addf %109, %108 : vector<8x128xf32>
    %111 = arith.divf %109, %110 : vector<8x128xf32>
    %112 = math.tanh %106 : vector<8x128xf32>
    %113 = arith.select %12, %112, %111 : vector<8x128xi1>, vector<8x128xf32>
    %114 = vector.extract_strided_slice %113 {offsets = [0, 0], sizes = [8, 32], strides = [1, 1]} : vector<8x128xf32> to vector<8x32xf32>
    %115 = vector.extract_strided_slice %113 {offsets = [0, 32], sizes = [8, 32], strides = [1, 1]} : vector<8x128xf32> to vector<8x32xf32>
    %116 = vector.extract_strided_slice %113 {offsets = [0, 64], sizes = [8, 32], strides = [1, 1]} : vector<8x128xf32> to vector<8x32xf32>
    %117 = vector.extract_strided_slice %113 {offsets = [0, 96], sizes = [8, 32], strides = [1, 1]} : vector<8x128xf32> to vector<8x32xf32>
    %118 = arith.mulf %115, %92 : vector<8x32xf32>
    %119 = arith.mulf %114, %116 : vector<8x32xf32>
    %120 = arith.addf %118, %119 : vector<8x32xf32>
    %121 = math.tanh %120 : vector<8x32xf32>
    %122 = arith.mulf %117, %121 : vector<8x32xf32>
    %123 = arith.index_cast %c3_i32 : i32 to index
    %c0_28 = arith.constant 0 : index
    %c0_29 = arith.constant 0 : index
    %124 = vector.load %arg3[%123, %c0_28, %c0_29] : memref<4x8x32xf32, #tpu.memory_space<vmem>>, vector<1x8x32xf32>
    %125 = vector.shape_cast %124 : vector<1x8x32xf32> to vector<8x32xf32>
    %126 = vector.shape_cast %122 : vector<8x32xf32> to vector<1x8x32xf32>
    tpu.vector_store %arg3[%123, %c0_28, %c0_29], %126 {strides = array<i32>} : memref<4x8x32xf32, #tpu.memory_space<vmem>>, vector<1x8x32xf32>,
    %c4_i32_30 = arith.constant 4 : i32
    %c0_31 = arith.constant 0 : index
    %c0_32 = arith.constant 0 : index
    %127 = vector.load %arg4[%c0_31, %c0_32] : memref<8x32xf32, #tpu.memory_space<vmem>>, vector<8x32xf32>
    tpu.vector_store %arg4[%c0_31, %c0_32], %122 {strides = array<i32>} : memref<8x32xf32, #tpu.memory_space<vmem>>, vector<8x32xf32>,
    %c0_33 = arith.constant 0 : index
    %c0_34 = arith.constant 0 : index
    %128 = vector.load %arg5[%c0_33, %c0_34] : memref<8x32xf32, #tpu.memory_space<vmem>>, vector<8x32xf32>
    tpu.vector_store %arg5[%c0_33, %c0_34], %120 {strides = array<i32>} : memref<8x32xf32, #tpu.memory_space<vmem>>, vector<8x32xf32>,
    return
  }
  func.func @transform_0(%arg0: i32) -> (i32, i32, i32) {
    %c0_i32 = arith.constant 0 : i32
    %c0_i32_0 = arith.constant 0 : i32
    %c0_i32_1 = arith.constant 0 : i32
    return %arg0, %c0_i32, %c0_i32_0 : i32, i32, i32
  }
  func.func @transform_1(%arg0: i32) -> (i32, i32) {
    %c0_i32 = arith.constant 0 : i32
    %c0_i32_0 = arith.constant 0 : i32
    %c0_i32_1 = arith.constant 0 : i32
    return %c0_i32, %c0_i32_0 : i32, i32
  }
  func.func @transform_2(%arg0: i32) -> (i32, i32, i32) {
    %c0_i32 = arith.constant 0 : i32
    %c0_i32_0 = arith.constant 0 : i32
    %c0_i32_1 = arith.constant 0 : i32
    return %arg0, %c0_i32, %c0_i32_0 : i32, i32, i32
  }
}

</mosaic_0001>

<bundles_post_ra>
// kernel: tpu_custom_call.1
= control target key start
LH: loop header
LB: loop body
LE: loop exit
PB: predicated region body
PF: predicated region fallthrough
CT: control target
= control target key end

     0   :  { %7 = vsyncpa [#allocation5], 0  ;;  %s1350_s0 = inlined_call_operand.hbm [shape: f32[8,8,128], index: 0, kind: input, shape index: {}]   ;;  %s1351_s1 = inlined_call_operand.hbm [shape: f32[32,256], index: 1, kind: input, shape index: {}]   ;;  %s1352_s2 = inlined_call_operand.hbm [shape: f32[8,8,32], index: 2, kind: output, shape index: {}]  }
   0x1   :  { %9 = vsyncpa [#allocation5 + $0x1], 0 }
   0x2   :  { %10 = vsyncpa [#allocation8], 0 }
   0x3   :  { %11 = vsyncpa [#allocation6], 0 }
   0x4   :  { %13 = vsyncpa [#allocation6 + $0x1], 0  ;;  %s1067_s9 = smov 0   ;;  %s1069_s10 = smov 0  }
   0x5   :  { %s1071_s11 = smov 0   ;;  %s1073_s12 = smov 0  }
   0x6 LB: > { %s1088_s13 = sadd.s32 4294967295, %s1036_s12   ;;  %s743_s14 = sadd.s32 4294967294, %s1036_s12   ;;  %s1036_s12 = sphi %s1073_s12, %s1375_s12   ;;  %s1032_s11 = sphi %s1071_s11, %s1374_s11   ;;  %s1028_s10 = sphi %s1069_s10, %s1373_s10   ;;  %s1024_s9 = sphi %s1067_s9, %s1372_s9  }
   0x7   : > { %p39_p0 = scmp.ne.s32.totalorder %s1028_s10, %s1024_s9  ;;  %p1353_p1 = scmp.eq.s32.totalorder %s1088_s13, 0 }
   0x8   : > { %p90_p3 = scmp.eq.s32.totalorder %s743_s14, 1  ;;  %p744_p5 = scmp.ge.s32.totalorder %s1036_s12, 1 }
   0x9   : > { %p1097_p4 = por %p1353_p1, %p39_p0  ;;  %p97_p7 = scmp.lt.s32.totalorder %s1036_s12, 3 }
   0xa   : > { %p1102_p6 = por %p90_p3, %p39_p0  ;;  %s1038_s18 = smov [#allocation7]  }
   0xb   : > { %s1356_s15 = scalar_select %p1097_p4, 1, 0 }
   0xc   : > { %s1357_s16 = scalar_select %p1102_p6, 1, 0 }
   0xd   : > { %p1108_p9 = pnand %p744_p5, %p97_p7  ;;  %s109_s19 = sshll.u32 %s1038_s18, 4  ;;  %s1112_s19 = int_to_ptr.vmem [resolvable:$true] %s109_s19 }
   0xe   : > { %s1124_s21 = sadd.s32 1, %s1036_s12   ;;  %s26_s22 = sadd.s32 1, %s1032_s11 }
   0xf   : > { %s1358_s17 = scalar_select %p1108_p9, 1, 0 }
  0x10   : > { %p816_p10 = pneg %p1108_p9  ;;  %s23_s23 = ssub.s32 %s1036_s12, %s1124_s21 }
  0x11   : > { %s908_s26 = scalar_lea.hbm %s1351_s1, 1024 }
  0x12   : > { %p1119_p12 = pnand %p816_p10, %p1353_p1  ;;  %p909_p13 = scmp.ne.s32.totalorder %s1351_s1, %s908_s26 }
  0x13   : > { %p915_p7 = scmp.lt.u32.totalorder %s908_s26, %s1351_s1 }
  0x14   : > { %p910_p0 = pneg %p1119_p12 }
  0x16   : > { %p911_p3 = pnand %p910_p0, %p909_p13 }
  0x18   : > { %p912_p5 = pneg %p911_p3 }
  0x1a   : > { %p917_p10 = pnand %p915_p7, %p912_p5 }
  0x1c   : > { %920 = shalt.err (!%p917_p10)
}
  0x1d   : > { %s921_s3 = scalar_lea.vmem %s1112_s19, 1024  ;;  %p929_p2 = scmp.lt.s32.totalorder %s1112_s19, %s1112_s19 }
  0x1e   : > { %p922_p11 = scmp.ne.s32.totalorder %s1112_s19, %s921_s3  ;;  %p930_p6 = scmp.lt.s32.totalorder %s921_s3, %s921_s3 }
  0x20   : > { %p924_p8 = pnand %p922_p11, %p910_p0  ;;  %p931_p4 = por %p930_p6, %p929_p2 }
  0x22   : > { %p925_p1 = pneg %p924_p8 }
  0x24   : > { %p932_p9 = pnand %p931_p4, %p925_p1 }
  0x26   : > { %935 = shalt.err (!%p932_p9)
}
  0x27   : > { %s1039_s4 = smov 256   ;;  %s1040_s5 = smov 16  }
  0x28   : > { %819 = dma.hbm_to_vmem [thread:$0]  (!%p1119_p12), %s1351_s1, 1024, %s1112_s19, [#allocation8], %s1039_s4, %s1039_s4, %s1040_s5  }
  0x29   : > { %p24_p2 = scmp.eq.s32.totalorder %s23_s23, 0  ;;  %p33_p1 = scmp.ne.s32.totalorder %s1032_s11, %s1028_s10 }
  0x2a   : > { %p34_p4 = scmp.eq.s32.totalorder %s1036_s12, 0  ;;  %p829_p6 = scmp.lt.s32.totalorder %s1036_s12, 2 }
  0x2b   : > { %s1155_s8 = scalar_select %p24_p2, %s1032_s11, %s26_s22  }
  0x2c   : > { %p35_p8 = por %p34_p4, %p33_p1  ;;  %p1360_p9 = scmp.eq.s32.totalorder %s1088_s13, 1 }
  0x2d   : > { %s123_s18 = sand.u32 1, %s1032_s11   ;;  %s774_s24 = sshll.u32 %s1036_s12, 9 }
  0x2e   : > { %p1159_p11 = por %p1360_p9, %p33_p1  ;;  %s747_s25 = sshll.u32 %s123_s18, 5 }
  0x2f   : > { %s1168_s27 = scalar_lea.hbm %s1350_s0, %s774_s24  ;;  %s127_s19 = scalar_lea.vmem [#allocation4], %s747_s25 }
  0x30   : > { %s134_s22 = sshll.u32 %s127_s19, 4  ;;  %p1170_p12 = pnand %p829_p6, %p35_p8  ;;  %s1174_s22 = int_to_ptr.vmem [resolvable:$true] %s134_s22 }
  0x31   : > { %s1176_s28 = scalar_lea.sflag [#allocation5], %s123_s18  ;;  %s936_s29 = scalar_lea.hbm %s1168_s27, 512 }
  0x32   : > { %p937_p13 = scmp.ne.s32.totalorder %s1168_s27, %s936_s29  ;;  %p938_p0 = pneg %p1170_p12 }
  0x33   : > { %s941_s4 = scalar_lea.hbm %s1350_s0, 1024  ;;  %p942_p7 = scmp.lt.u32.totalorder %s1168_s27, %s1350_s0 }
  0x34   : > { %p939_p3 = pnand %p938_p0, %p937_p13  ;;  %p943_p10 = scmp.lt.u32.totalorder %s941_s4, %s936_s29 }
  0x35   : > { %p945_p1 = scmp.lt.u32.totalorder %s936_s29, %s1168_s27 }
  0x36   : > { %p940_p5 = pneg %p939_p3  ;;  %p944_p2 = por %p943_p10, %p942_p7 }
  0x38   : > { %p946_p4 = por %p945_p1, %p944_p2 }
  0x3a   : > { %p947_p6 = pnand %p946_p4, %p940_p5 }
  0x3c   : > { %950 = shalt.err (!%p947_p6)
}
  0x3d   : > { %s951_s7 = scalar_lea.vmem %s1174_s22, 512  ;;  %s1041_s18 = smov [#allocation4]  }
  0x3e   : > { %p952_p8 = scmp.ne.s32.totalorder %s1174_s22, %s951_s7  ;;  %s956_s24 = sshll.u32 %s1041_s18, 4  ;;  %s957_s24 = int_to_ptr.vmem [resolvable:$false] %s956_s24 }
  0x3f   : > { %s958_s25 = scalar_lea.vmem %s957_s24, 1024  ;;  %p959_p3 = scmp.lt.s32.totalorder %s1174_s22, %s957_s24 }
  0x40   : > { %p954_p9 = pnand %p952_p8, %p938_p0  ;;  %p960_p7 = scmp.lt.s32.totalorder %s958_s25, %s951_s7 }
  0x42   : > { %p955_p13 = pneg %p954_p9  ;;  %p961_p10 = por %p960_p7, %p959_p3 }
  0x44   : > { %p962_p2 = pnand %p961_p10, %p955_p13 }
  0x46   : > { %965 = shalt.err (!%p962_p2)
}
  0x47   : > { %s1042_s20 = smov 128   ;;  %s1043_s26 = smov 8  }
  0x48   : > { %823 = dma.hbm_to_vmem [thread:$0]  (!%p1170_p12), %s1168_s27, 512, %s1174_s22, %s1176_s28, %s1042_s20, %s1042_s20, %s1043_s26  }
  0x49   : > { %p1363_p0 = scmp.ne.s32.totalorder %s1358_s17, 0 }
  0x4a   : > { %s1207_s19 = sand.u32 (!%p1363_p0), 1, %s1028_s10   ;;  %p1364_p5 = scmp.ne.s32.totalorder (!%p1363_p0), %s1356_s15, 0 }
  0x4b   : > { %146 = sbr.rel (%p1363_p0) target bundleno = 3001 (0xbb9), region = 28  ;;  %s751_s29 = sshll.u32 (!%p1363_p0), %s1207_s19, 5 }
  0x4c   : > { %s149_s30 = scalar_lea.sflag (!%p1363_p0), [#allocation5], %s1207_s19  ;;  %s1211_s3 = scalar_lea.vmem (!%p1363_p0), [#allocation4], %s751_s29 }
  0x52   : > { %1011 = dma.done.wait (%p1364_p5), %s149_s30, 512  }
  0x53   : > { %1013 = vsyncadd (%p1364_p5), %s149_s30, 4294966784  ;;  %p1365_p12 = scmp.eq.s32.totalorder %s1088_s13, 0 }
  0x55   : > { %1015 = dma.done.wait (%p1365_p12), [#allocation8], 1024   ;;  %p1366_p1 = pmov %p1365_p12 }
  0x56   : > { %s1221_s17 = scalar_lea.vmem [#allocation9], %s751_s29  ;;  %p1367_p4 = scmp.ne.s32.totalorder %s1088_s13, 0 }
  0x57   : > { %1017 = vsyncadd (%p1366_p1), [#allocation8], 4294966272  ;;  %vm183_vm0 = vcmask (!%p1367_p4), 261120   ;;  %v1044_v0 = vmov (!%p1367_p4), 0.0  }
  0x58   : > { %182 = sbr.rel (%p1367_p4) target bundleno = 95 (0x5f), region = 40  ;;  %184 = vst.msk [vmem:[#allocation2] sm:$0xff] (!%p1367_p4), %vm183_vm0, %v1044_v0  ;;  %185 = vst.msk [vmem:[#allocation3] sm:$0xff] (!%p1367_p4), %vm183_vm0, %v1044_v0 }
  0x5f PF: > { %v187_v1 = vld [vmem:[#allocation7 + $0x8] sm:$0xff]  ;;  %v189_v2 = vld [vmem:[#allocation7 + $0x18] sm:$0xff]  ;;  %v186_v3 = vld [vmem:[#allocation7] sm:$0xff]  ;;  %v1045_v8 = vmov 0.0   ;;  %vm204_vm1 = vcmask 261120   ;;  %v194_v15 = vlaneseq  ;;  %s1046_s15 = smov 64  }
  0x60   : > { %v776_v4 = vpack.c.bf16 %v189_v2, %v187_v1  ;;  %v188_v5 = vld [vmem:[#allocation7 + $0x10] sm:$0xff]  ;;  %v191_v6 = vld [vmem:[#allocation7 + $0x28] sm:$0xff]  ;;  %v193_v7 = vld [vmem:[#allocation7 + $0x38] sm:$0xff]  ;;  %272 = vmatprep.mubr.f32.mxu0 %v1045_v8  ;;  %382 = vmatprep.mubr.f32.mxu1 %v1045_v8  ;;  %s1047_s27 = smov 32   ;;  %s1048_s22 = smov 96  }
  0x61   : > { %v1227_v9 = vpack.c.bf16 %v188_v5, %v186_v3  ;;  %v1229_v10 = vpack.c.bf16 %v193_v7, %v191_v6  ;;  %v190_v11 = vld [vmem:[#allocation7 + $0x20] sm:$0xff]  ;;  %v192_v12 = vld [vmem:[#allocation7 + $0x30] sm:$0xff]  ;;  %v1239_v16 = vshrl.u32 %v194_v15, 7  ;;  %v198_v25 = vand.u32 127, %v194_v15  ;;  %v203_v30 = vld [vmem:[#allocation3] sm:$0xff]  ;;  %s775_s23 = sshll.u32 %s1088_s13, 9 }
  0x62   : > { %777 = vmatprep.subr.bf16.mxu0 %v776_v4  ;;  %785 = vmatprep.subr.bf16.mxu1 %v776_v4  ;;  %v782_v13 = vpack.c.bf16 %v192_v12, %v190_v11  ;;  %v202_v14 = vld [vmem:[#allocation2] sm:$0xff]  ;;  %v280_v18 = vld [vmem:[%s1211_s3] sm:$0xff]  ;;  %v758_v42 = vld [vmem:[%s1211_s3 + $0x8] sm:$0xff]  ;;  %s660_s28 = sshll.u32 %s1221_s17, 4  ;;  %s1301_s6 = scalar_lea.hbm %s1352_s2, %s775_s23  ;;  %s1303_s28 = int_to_ptr.vmem [resolvable:$true] %s660_s28 }
  0x63   : > { %779 = vmatpush1.bf16.msra.mxu0 %v1227_v9  ;;  %787 = vmatpush1.bf16.msra.mxu1 %v1227_v9  ;;  %vm196_vm2 = vcmp.lt.s32.totalorder %v1239_v16, 4  ;;  %vm199_vm3 = vcmp.ge.s32.totalorder %v198_v25, 64  ;;  %vm200_vm4 = vcmp.lt.s32.totalorder %v198_v25, 96  ;;  %v762_v62 = vld [vmem:[%s1211_s3 + $0x10] sm:$0xff]  ;;  %s647_s7 = scalar_lea.sflag [#allocation6], %s1207_s19  ;;  %s966_s18 = scalar_lea.vmem %s1303_s28, 512 }
  0x64   : > { %781 = vmatprep.subr.bf16.mxu0 %v1229_v10  ;;  %789 = vmatprep.subr.bf16.mxu1 %v1229_v10  ;;  %vm1245_vm5 = vmand %vm199_vm3, %vm200_vm4  ;;  %p967_p6 = scmp.ne.s32.totalorder %s1303_s28, %s966_s18  ;;  %s1049_s13 = smov [#allocation9]  }
  0x65   : > { %s970_s24 = sshll.u32 %s1049_s13, 4  ;;  %s971_s24 = int_to_ptr.vmem [resolvable:$false] %s970_s24 }
  0x66   : > { %p968_p8 = pnand %p967_p6, %p1159_p11  ;;  %s972_s25 = scalar_lea.vmem %s971_s24, 1024 }
  0x67   : > { %783 = vmatpush1.bf16.msra.mxu0 %v782_v13  ;;  %791 = vmatpush1.bf16.msra.mxu1 %v782_v13  ;;  %p973_p13 = scmp.lt.s32.totalorder %s1303_s28, %s971_s24  ;;  %p974_p3 = scmp.lt.s32.totalorder %s972_s25, %s966_s18 }
  0x68   : > { %793 = vmatprep.subr.bf16.mxu0 %v776_v4  ;;  %801 = vmatprep.subr.bf16.mxu1 %v776_v4  ;;  %p969_p9 = pneg %p968_p8 }
  0x69   : > { %p975_p7 = por %p974_p3, %p973_p13 }
  0x6a   : > { %755 = vmatmul.mubr.msk.f32.vlgmr.msra.gmra.mrb[0].mxu0 %vm204_vm1, %v202_v14 }
  0x6b   : > { %795 = vmatpush1.bf16.msra.mxu0 %v1227_v9  ;;  %490 = vmatprep.mubr.f32.mxu0 %v1045_v8  ;;  %p976_p10 = pnand %p975_p7, %p969_p9 }
  0x6c   : > { %797 = vmatprep.subr.bf16.mxu0 %v1229_v10 }
  0x6f   : > { %799 = vmatpush1.bf16.msra.mxu0 %v782_v13 }
 0x13d   : > { %v274_v17 = vpop.f32.mrb[0].mxu0 }
 0x13e   : > { %v276_v19 = vpop.f32.mrb[1].mxu0 }
 0x13f   : > { %v279_v20 = vsel %vm196_vm2, %v274_v17, %v276_v19  ;;  %v766_v19 = vld [vmem:[%s1211_s3 + $0x18] sm:$0xff] }
 0x140   : > { %v281_v21 = vadd.f32 %v280_v18, %v279_v20 }
 0x142   : > { %v756_v22 = vmul.f32 -1.442695, %v281_v21 }
 0x144   : > { %876 = vpow2.f32 %v756_v22 }
 0x145   : > { %878 = vtanh.f32 %v281_v21 }
 0x14e   : > { %v877_v23 = vpop.eup %876 }
 0x14f   : > { %v285_v24 = vadd.f32 1.0, %v877_v23  ;;  %v879_v27 = vpop.eup %878 }
 0x151   : > { %880 = vrcp.f32 %v285_v24 }
 0x15b   : > { %v881_v28 = vpop.eup %880 }
 0x15c   : > { %v289_v29 = vsel %vm1245_vm5, %v879_v27, %v881_v28 }
 0x15d   : > { %296 = vrot.lane.b32.xlu0 %v289_v29, %s1046_s15 }
 0x161   : > { %291 = vrot.lane.b32.xlu0 %v203_v30, %s1047_s27 }
 0x1cf   : > { %v297_v31 = vpop.permute.xlu0 %296 }
 0x1d0   : > { %v299_v32 = vmul.f32 %v297_v31, %v289_v29 }
 0x1d2   : > { %301 = vrot.lane.b32.xlu1 %v299_v32, %s1047_s27 }
 0x1d3   : > { %v292_v33 = vpop.permute.xlu0 %291 }
 0x1d4   : > { %v294_v34 = vmul.f32 %v292_v33, %v289_v29 }
 0x244   : > { %v302_v35 = vpop.permute.xlu1 %301 }
 0x245   : > { %v304_v36 = vadd.f32 %v302_v35, %v294_v34 }
 0x247   : > { %882 = vtanh.f32 %v304_v36 }
 0x251   : > { %v883_v37 = vpop.eup %882 }
 0x252   : > { %307 = vrot.lane.b32.xlu1 %v883_v37, %s1046_s15 }
 0x2c4   : > { %v308_v38 = vpop.permute.xlu1 %307 }
 0x2c5   : > { %v310_v39 = vmul.f32 %v308_v38, %v289_v29 }
 0x2c7   : > { %312 = vrot.lane.b32.xlu0 %v310_v39, %s1047_s27 }
 0x339   : > { %v313_v40 = vpop.permute.xlu0 %312 }
 0x33a   : > { %315 = vst.msk [vmem:[%s1221_s17] sm:$0xff] %vm204_vm1, %v313_v40  ;;  %757 = vmatmul.mubr.msk.f32.vlgmr.msra.gmra.mrb[0].mxu1 %vm204_vm1, %v313_v40 }
 0x33b   : > { %803 = vmatpush1.bf16.msra.mxu1 %v1227_v9  ;;  %598 = vmatprep.mubr.f32.mxu1 %v1045_v8 }
 0x33c   : > { %805 = vmatprep.subr.bf16.mxu1 %v1229_v10 }
 0x33f   : > { %807 = vmatpush1.bf16.msra.mxu1 %v782_v13 }
 0x40d   : > { %v384_v41 = vpop.f32.mrb[0].mxu1 }
 0x40e   : > { %v386_v43 = vpop.f32.mrb[1].mxu1 }
 0x40f   : > { %v389_v44 = vsel %vm196_vm2, %v384_v41, %v386_v43 }
 0x410   : > { %v392_v45 = vadd.f32 %v758_v42, %v389_v44 }
 0x412   : > { %v759_v46 = vmul.f32 -1.442695, %v392_v45 }
 0x414   : > { %884 = vpow2.f32 %v759_v46 }
 0x415   : > { %886 = vtanh.f32 %v392_v45 }
 0x41e   : > { %v885_v47 = vpop.eup %884 }
 0x41f   : > { %v396_v48 = vadd.f32 1.0, %v885_v47  ;;  %v887_v49 = vpop.eup %886 }
 0x421   : > { %888 = vrcp.f32 %v396_v48 }
 0x42b   : > { %v889_v50 = vpop.eup %888 }
 0x42c   : > { %v400_v51 = vsel %vm1245_vm5, %v887_v49, %v889_v50 }
 0x42d   : > { %403 = vrot.lane.b32.xlu1 %v400_v51, %s1046_s15  ;;  %v401_v54 = vmul.f32 %v400_v51, %v304_v36 }
 0x49f   : > { %v404_v52 = vpop.permute.xlu1 %403 }
 0x4a0   : > { %v406_v53 = vmul.f32 %v404_v52, %v400_v51 }
 0x4a2   : > { %408 = vrot.lane.b32.xlu0 %v406_v53, %s1047_s27 }
 0x514   : > { %v409_v55 = vpop.permute.xlu0 %408 }
 0x515   : > { %v411_v56 = vadd.f32 %v409_v55, %v401_v54 }
 0x517   : > { %890 = vtanh.f32 %v411_v56 }
 0x521   : > { %v891_v57 = vpop.eup %890 }
 0x522   : > { %414 = vrot.lane.b32.xlu1 %v891_v57, %s1046_s15 }
 0x594   : > { %v415_v58 = vpop.permute.xlu1 %414 }
 0x595   : > { %v417_v59 = vmul.f32 %v415_v58, %v400_v51 }
 0x597   : > { %419 = vrot.lane.b32.xlu0 %v417_v59, %s1047_s27 }
 0x609   : > { %v420_v60 = vpop.permute.xlu0 %419 }
 0x60a   : > { %760 = vst.msk [vmem:[%s1221_s17 + $0x8] sm:$0xff] %vm204_vm1, %v420_v60  ;;  %761 = vmatmul.mubr.msk.f32.vlgmr.msra.gmra.mrb[2].mxu0 %vm204_vm1, %v420_v60 }
 0x6dd   : > { %v492_v61 = vpop.f32.mrb[2].mxu0 }
 0x6de   : > { %v494_v63 = vpop.f32.mrb[3].mxu0 }
 0x6df   : > { %v497_v0 = vsel %vm196_vm2, %v492_v61, %v494_v63 }
 0x6e0   : > { %v500_v1 = vadd.f32 %v762_v62, %v497_v0 }
 0x6e2   : > { %v763_v2 = vmul.f32 -1.442695, %v500_v1 }
 0x6e4   : > { %892 = vpow2.f32 %v763_v2 }
 0x6e5   : > { %894 = vtanh.f32 %v500_v1 }
 0x6ee   : > { %v893_v3 = vpop.eup %892 }
 0x6ef   : > { %v504_v4 = vadd.f32 1.0, %v893_v3  ;;  %v895_v5 = vpop.eup %894 }
 0x6f1   : > { %896 = vrcp.f32 %v504_v4 }
 0x6fb   : > { %v897_v6 = vpop.eup %896 }
 0x6fc   : > { %v508_v7 = vsel %vm1245_vm5, %v895_v5, %v897_v6 }
 0x6fd   : > { %511 = vrot.lane.b32.xlu1 %v508_v7, %s1046_s15  ;;  %v509_v10 = vmul.f32 %v508_v7, %v411_v56 }
 0x76f   : > { %v512_v8 = vpop.permute.xlu1 %511 }
 0x770   : > { %v514_v9 = vmul.f32 %v512_v8, %v508_v7 }
 0x772   : > { %516 = vrot.lane.b32.xlu0 %v514_v9, %s1047_s27 }
 0x7e4   : > { %v517_v11 = vpop.permute.xlu0 %516 }
 0x7e5   : > { %v519_v12 = vadd.f32 %v517_v11, %v509_v10 }
 0x7e7   : > { %898 = vtanh.f32 %v519_v12 }
 0x7f1   : > { %v899_v13 = vpop.eup %898 }
 0x7f2   : > { %522 = vrot.lane.b32.xlu1 %v899_v13, %s1046_s15 }
 0x864   : > { %v523_v14 = vpop.permute.xlu1 %522 }
 0x865   : > { %v525_v15 = vmul.f32 %v523_v14, %v508_v7 }
 0x867   : > { %527 = vrot.lane.b32.xlu0 %v525_v15, %s1047_s27 }
 0x8d9   : > { %v528_v17 = vpop.permute.xlu0 %527 }
 0x8da   : > { %764 = vst.msk [vmem:[%s1221_s17 + $0x10] sm:$0xff] %vm204_vm1, %v528_v17  ;;  %765 = vmatmul.mubr.msk.f32.vlgmr.msra.gmra.mrb[2].mxu1 %vm204_vm1, %v528_v17 }
 0x9ad   : > { %v600_v18 = vpop.f32.mrb[2].mxu1 }
 0x9ae   : > { %v602_v20 = vpop.f32.mrb[3].mxu1 }
 0x9af   : > { %v605_v21 = vsel %vm196_vm2, %v600_v18, %v602_v20 }
 0x9b0   : > { %v608_v22 = vadd.f32 %v766_v19, %v605_v21 }
 0x9b2   : > { %v767_v23 = vmul.f32 -1.442695, %v608_v22 }
 0x9b4   : > { %900 = vpow2.f32 %v767_v23 }
 0x9b5   : > { %902 = vtanh.f32 %v608_v22 }
 0x9be   : > { %v901_v24 = vpop.eup %900 }
 0x9bf   : > { %v612_v25 = vadd.f32 1.0, %v901_v24  ;;  %v903_v27 = vpop.eup %902 }
 0x9c1   : > { %904 = vrcp.f32 %v612_v25 }
 0x9cb   : > { %v905_v28 = vpop.eup %904 }
 0x9cc   : > { %v616_v29 = vsel %vm1245_vm5, %v903_v27, %v905_v28 }
 0x9cd   : > { %619 = vrot.lane.b32.xlu1 %v616_v29, %s1046_s15  ;;  %v617_v16 = vmul.f32 %v616_v29, %v519_v12 }
 0xa3f   : > { %v620_v30 = vpop.permute.xlu1 %619 }
 0xa40   : > { %v622_v31 = vmul.f32 %v620_v30, %v616_v29 }
 0xa42   : > { %624 = vrot.lane.b32.xlu0 %v622_v31, %s1047_s27 }
 0xab4   : > { %v625_v32 = vpop.permute.xlu0 %624 }
 0xab5   : > { %v627_v33 = vadd.f32 %v625_v32, %v617_v16 }
 0xab7   : > { %906 = vtanh.f32 %v627_v33 }
 0xac1   : > { %v907_v34 = vpop.eup %906 }
 0xac2   : > { %630 = vrot.lane.b32.xlu1 %v907_v34, %s1046_s15 }
 0xac6   : > { %642 = vrot.lane.b32.xlu1 %v627_v33, %s1048_s22 }
 0xb34   : > { %v631_v26 = vpop.permute.xlu1 %630 }
 0xb35   : > { %v633_v35 = vmul.f32 %v631_v26, %v616_v29 }
 0xb37   : > { %635 = vrot.lane.b32.xlu0 %v633_v35, %s1047_s27 }
 0xb38   : > { %v643_v36 = vpop.permute.xlu1 %642 }
 0xb39   : > { %645 = vst.msk [vmem:[#allocation3] sm:$0xff] %vm204_vm1, %v643_v36 }
 0xba9   : > { %v636_v37 = vpop.permute.xlu0 %635 }
 0xbaa   : > { %768 = vst.msk [vmem:[%s1221_s17 + $0x18] sm:$0xff] %vm204_vm1, %v636_v37  ;;  %640 = vst.msk [vmem:[#allocation2] sm:$0xff] %vm204_vm1, %v636_v37 }
 0xbab   : > { %979 = shalt.err (!%p976_p10)
}
 0xbac   : > { %s980_s20 = scalar_lea.hbm %s1301_s6, 512  ;;  %s984_s30 = scalar_lea.hbm %s1352_s2, 1024 }
 0xbad   : > { %p981_p2 = scmp.ne.s32.totalorder %s1301_s6, %s980_s20  ;;  %p985_p12 = scmp.lt.u32.totalorder %s1301_s6, %s1352_s2 }
 0xbae   : > { %p986_p1 = scmp.lt.u32.totalorder %s984_s30, %s980_s20  ;;  %p988_p6 = scmp.lt.u32.totalorder %s980_s20, %s1301_s6 }
 0xbaf   : > { %p982_p0 = pnand %p981_p2, %p1159_p11 }
 0xbb0   : > { %p987_p4 = por %p986_p1, %p985_p12 }
 0xbb1   : > { %p983_p5 = pneg %p982_p0 }
 0xbb2   : > { %p989_p8 = por %p988_p6, %p987_p4 }
 0xbb4   : > { %p990_p9 = pnand %p989_p8, %p983_p5 }
 0xbb6   : > { %993 = shalt.err (!%p990_p9)
}
 0xbb7   : > { %s1050_s15 = smov 128   ;;  %s1051_s27 = smov 8  }
 0xbb8   : > { %814 = dma.vmem_to_hbm [thread:$0]  (%p1159_p11), %s1303_s28, 512, %s1301_s6, %s647_s7, %s1050_s15, %s1050_s15, %s1051_s27  }
 0xbb9 PF: > { %s675_s22 = sand.u32 1, %s1024_s9   ;;  %p1370_p13 = scmp.ne.s32.totalorder %s1357_s16, 0 }
 0xbba   : > { %p1371_p3 = scmp.ge.s32.totalorder %s1036_s12, 2  ;;  %s676_s23 = scalar_lea.sflag [#allocation6], %s675_s22 }
 0xbbc   : > { %p825_p7 = pnand %p1371_p3, %p1370_p13 }
 0xbbe   : > { %1019 = dma.done.wait (!%p825_p7), %s676_s23, 512  }
 0xbbf   : > { %1021 = vsyncadd (!%p825_p7), %s676_s23, 4294966784  ;;  %p16_p10 = scmp.ge.s32.totalorder %s1124_s21, 4   ;;  %s1372_s9 = smov %s1028_s10 }
 0xbc0   : > { %s1373_s10 = smov %s1032_s11  ;;  %s1374_s11 = smov %s1155_s8 }
 0xbc1   : > { %s1375_s12 = smov %s1124_s21  ;;  %18 = sbr.rel (!%p16_p10) target bundleno = 6 (0x6), region = 87 }
 0xbc8   :  { %681 = vsyncpa [#allocation5], 1 }
 0xbc9   :  { %683 = vsyncpa [#allocation5 + $0x1], 1 }
 0xbca   :  { %684 = vsyncpa [#allocation8], 1 }
 0xbcb   :  { %685 = vsyncpa [#allocation6], 1 }
 0xbcc   :  { %687 = vsyncpa [#allocation6 + $0x1], 1 }

</bundles_post_ra>
